<compile_context>
chip_gen: v7x
topology: tpu7x:2x2x1
jax: 0.10.0
libtpu: 0.0.40
codegen_flags: <defaults>
</compile_context>

<pallas_src>
import jax
import jax.numpy as jnp
from jax import lax
from jax.experimental import pallas as pl
from jax.experimental.pallas import tpu as pltpu


def _round_up(a: int, b: int) -> int:
    return ((a + b - 1) // b) * b


def _accumulate(x_ref, w_ref, acc_ref):
    # w_ref: (1, tk), x_ref: (tn, tk) -> (1, tn); contract the feature axis of
    # both operands (no transpose op emitted, q·kᵀ-style MXU pattern).
    acc_ref[...] += lax.dot_general(
        w_ref[...],
        x_ref[...],
        dimension_numbers=(((1,), (1,)), ((), ())),
        preferred_element_type=jnp.float32,
    )


def _elnet_kernel_nobias(x_ref, w_ref, o_ref, acc_ref):
    k = pl.program_id(1)

    @pl.when(k == 0)
    def _():
        acc_ref[...] = jnp.zeros_like(acc_ref)

    _accumulate(x_ref, w_ref, acc_ref)

    @pl.when(k == pl.num_programs(1) - 1)
    def _():
        o_ref[...] = acc_ref[...].astype(o_ref.dtype)


def _elnet_kernel_bias(x_ref, w_ref, b_ref, o_ref, acc_ref):
    k = pl.program_id(1)

    @pl.when(k == 0)
    def _():
        acc_ref[...] = jnp.zeros_like(acc_ref)

    _accumulate(x_ref, w_ref, acc_ref)

    @pl.when(k == pl.num_programs(1) - 1)
    def _():
        # b_ref is a (1,) SMEM scalar; fold it into the final store.
        o_ref[...] = (acc_ref[...] + b_ref[0]).astype(o_ref.dtype)


def elnet_forward(x, weight, bias=None, *, max_tn=1024, max_tk=2048):
    """Pallas implementation of ElNetModel.forward.

    x:      [N, P] float32
    weight: [1, P] float32  (torch.nn.Linear(x_dim, 1).weight)
    bias:   [1]    float32 or None
    returns [N, 1] float32
    """
    N, P = x.shape
    assert weight.shape == (1, P)
    dtype = x.dtype

    # Row tile (lane axis of the output): multiple of 128; feature tile: multiple
    # of 128.  Caps chosen so a (tn, tk) f32 block double-buffers (~16 MiB) well
    # inside v7x's 64 MiB VMEM and stays under the raised scoped limit below.
    tn = min(max_tn, _round_up(N, 128))
    tk = min(max_tk, _round_up(P, 128))
    n_pad = _round_up(N, tn)
    p_pad = _round_up(P, tk)

    if n_pad != N or p_pad != P:
        x = jnp.pad(x, ((0, n_pad - N), (0, p_pad - P)))
    if p_pad != P:
        weight = jnp.pad(weight, ((0, 0), (0, p_pad - P)))

    grid = (n_pad // tn, p_pad // tk)  # (rows: parallel, features: reduction last)
    x_spec = pl.BlockSpec((tn, tk), lambda i, k: (i, k))
    w_spec = pl.BlockSpec((1, tk), lambda i, k: (0, k))
    o_spec = pl.BlockSpec((1, tn), lambda i, k: (0, i))   # lane-dense output
    out_shape = jax.ShapeDtypeStruct((1, n_pad), dtype)
    scratch = [pltpu.VMEM((1, tn), jnp.float32)]
    cparams = pltpu.CompilerParams(
        dimension_semantics=("parallel", "arbitrary"),
        vmem_limit_bytes=32 * 1024 * 1024,
    )

    if bias is None:
        out = pl.pallas_call(
            _elnet_kernel_nobias,
            out_shape=out_shape,
            grid_spec=pltpu.PrefetchScalarGridSpec(
                num_scalar_prefetch=0,
                grid=grid,
                in_specs=[x_spec, w_spec],
                out_specs=o_spec,
                scratch_shapes=scratch,
            ),
            compiler_params=cparams,
        )(x, weight)
    else:
        b = jnp.asarray(bias, dtype=dtype).reshape((1,))
        b_spec = pl.BlockSpec(memory_space=pltpu.MemorySpace.SMEM)
        out = pl.pallas_call(
            _elnet_kernel_bias,
            out_shape=out_shape,
            grid_spec=pltpu.PrefetchScalarGridSpec(
                num_scalar_prefetch=0,
                grid=grid,
                in_specs=[x_spec, w_spec, b_spec],
                out_specs=o_spec,
                scratch_shapes=scratch,
            ),
            compiler_params=cparams,
        )(x, weight, b)

    # (1, n_pad) -> [N, 1]: pure layout plumbing in the wrapper.
    return out[0, :N].reshape(N, 1)


def elnet_loss(mse_loss, weight, lambda_, alpha):
    """Elastic-net penalized loss (plain JAX glue; matches ElNetModel.loss)."""
    l1 = jnp.abs(weight).sum()
    l2 = jnp.square(weight).sum()
    return mse_loss + lambda_ * (alpha * l1 + 0.5 * (1.0 - alpha) * l2)


if __name__ == "__main__":
    # Small shapes consistent with the module spec (x_dim = p = 100, real_p = 20),
    # with a small batch for the demo.
    N, P = 256, 100
    real_p = 20
    lambda_, alpha = 0.1, 0.5
    fit_intercept = False  # matches ElNetModel(x_dim=p, ..., fit_intercept=False)

    key = jax.random.PRNGKey(0)
    kx, kw, kb = jax.random.split(key, 3)

    x = jax.random.uniform(kx, (N, P), dtype=jnp.float32)

    # Deterministic parameter init mimicking torch.nn.Linear: U(-1/sqrt(P), 1/sqrt(P)).
    bound = 1.0 / float(P) ** 0.5
    weight = jax.random.uniform(kw, (1, P), dtype=jnp.float32,
                                minval=-bound, maxval=bound)
    bias = None
    if fit_intercept:
        bias = jax.random.uniform(kb, (1,), dtype=jnp.float32,
                                  minval=-bound, maxval=bound)

    # --- forward pass through the Pallas kernel (no-bias path, as in the spec) ---
    y_pred = elnet_forward(x, weight, bias)
    y_pred = jax.block_until_ready(y_pred)

    y_ref = x @ weight.T
    if bias is not None:
        y_ref = y_ref + bias.reshape(1, 1)
    assert y_pred.shape == (N, 1)
    assert jnp.allclose(y_pred, y_ref, atol=1e-5, rtol=1e-5)

    # --- also exercise the fit_intercept=True (bias-in-SMEM) path ---
    bias_b = jax.random.uniform(kb, (1,), dtype=jnp.float32,
                                minval=-bound, maxval=bound)
    y_pred_b = jax.block_until_ready(elnet_forward(x, weight, bias_b))
    y_ref_b = x @ weight.T + bias_b.reshape(1, 1)
    assert jnp.allclose(y_pred_b, y_ref_b, atol=1e-5, rtol=1e-5)

    # --- elastic-net loss (plain-JAX glue, parity with ElNetModel.loss) ---
    y_true = jnp.sum(x[:, :real_p], axis=1, keepdims=True)
    mse = jnp.mean((y_pred - y_true) ** 2)
    _ = jax.block_until_ready(elnet_loss(mse, weight, lambda_, alpha))

    print("KERNEL_OK")
</pallas_src>

<mosaic_0001>
module attributes {stable_mosaic.version = 11 : i64} {
  func.func @_elnet_kernel_nobias(%arg0: i32, %arg1: i32, %arg2: memref<256x128xf32, #tpu.memory_space<vmem>>, %arg3: memref<1x128xf32, #tpu.memory_space<vmem>>, %arg4: memref<1x256xf32, #tpu.memory_space<vmem>>, %arg5: memref<1x256xf32, #tpu.memory_space<vmem>>) attributes {dimension_semantics = [#tpu.dimension_semantics<parallel>, #tpu.dimension_semantics<arbitrary>], iteration_bounds = array<i64: 1, 1>, scalar_prefetch = 0 : i64, scratch_operands = 1 : i64, tpu.core_type = #tpu.core_type<tc>, window_params = [{transform_indices = @transform_0, window_bounds = array<i64: 256, 128>}, {transform_indices = @transform_1, window_bounds = array<i64: 1, 128>}, {transform_indices = @transform_2, window_bounds = array<i64: 1, 256>}]} {
    %c0_i32 = arith.constant 0 : i32
    %0 = arith.cmpi eq, %arg1, %c0_i32 : i32
    %1 = arith.extui %0 : i1 to i32
    %c0_i32_0 = arith.constant 0 : i32
    %2 = arith.cmpi ne, %1, %c0_i32_0 : i32
    scf.if %2 {
      %cst_10 = arith.constant 0.000000e+00 : f32
      %12 = vector.broadcast %cst_10 : f32 to vector<1x256xf32>
      %c0_11 = arith.constant 0 : index
      %c0_12 = arith.constant 0 : index
      %13 = vector.load %arg5[%c0_11, %c0_12] : memref<1x256xf32, #tpu.memory_space<vmem>>, vector<1x256xf32>
      tpu.vector_store %arg5[%c0_11, %c0_12], %12 {strides = array<i32>} : memref<1x256xf32, #tpu.memory_space<vmem>>, vector<1x256xf32>,
    } else {
    }
    %c0 = arith.constant 0 : index
    %c0_1 = arith.constant 0 : index
    %3 = vector.load %arg5[%c0, %c0_1] : memref<1x256xf32, #tpu.memory_space<vmem>>, vector<1x256xf32>
    %c0_2 = arith.constant 0 : index
    %c0_3 = arith.constant 0 : index
    %4 = vector.load %arg3[%c0_2, %c0_3] : memref<1x128xf32, #tpu.memory_space<vmem>>, vector<1x128xf32>
    %c0_4 = arith.constant 0 : index
    %c0_5 = arith.constant 0 : index
    %5 = vector.load %arg2[%c0_4, %c0_5] : memref<256x128xf32, #tpu.memory_space<vmem>>, vector<256x128xf32>
    %cst = arith.constant dense<0.000000e+00> : vector<1x256xf32>
    %6 = tpu.matmul %4, %5, %cst {dimension_numbers = #tpu.dot_dimension_numbers<[1], [1], [0], [0], [0, 0, 1, 0], [], []>} : vector<1x128xf32>, vector<256x128xf32>, vector<1x256xf32> -> vector<1x256xf32>
    %7 = arith.addf %3, %6 : vector<1x256xf32>
    %c0_6 = arith.constant 0 : index
    %c0_7 = arith.constant 0 : index
    %8 = vector.load %arg5[%c0_6, %c0_7] : memref<1x256xf32, #tpu.memory_space<vmem>>, vector<1x256xf32>
    tpu.vector_store %arg5[%c0_6, %c0_7], %7 {strides = array<i32>} : memref<1x256xf32, #tpu.memory_space<vmem>>, vector<1x256xf32>,
    %c0_i32_8 = arith.constant 0 : i32
    %9 = arith.cmpi eq, %arg1, %c0_i32_8 : i32
    %10 = arith.extui %9 : i1 to i32
    %c0_i32_9 = arith.constant 0 : i32
    %11 = arith.cmpi ne, %10, %c0_i32_9 : i32
    scf.if %11 {
      %c0_10 = arith.constant 0 : index
      %c0_11 = arith.constant 0 : index
      %12 = vector.load %arg5[%c0_10, %c0_11] : memref<1x256xf32, #tpu.memory_space<vmem>>, vector<1x256xf32>
      %c0_12 = arith.constant 0 : index
      %c0_13 = arith.constant 0 : index
      %13 = vector.load %arg4[%c0_12, %c0_13] : memref<1x256xf32, #tpu.memory_space<vmem>>, vector<1x256xf32>
      tpu.vector_store %arg4[%c0_12, %c0_13], %12 {strides = array<i32>} : memref<1x256xf32, #tpu.memory_space<vmem>>, vector<1x256xf32>,
    } else {
    }
    return
  }
  func.func @transform_0(%arg0: i32, %arg1: i32) -> (i32, i32) {
    %c0_i32 = arith.constant 0 : i32
    return %arg0, %arg1 : i32, i32
  }
  func.func @transform_1(%arg0: i32, %arg1: i32) -> (i32, i32) {
    %c0_i32 = arith.constant 0 : i32
    %c0_i32_0 = arith.constant 0 : i32
    return %c0_i32, %arg1 : i32, i32
  }
  func.func @transform_2(%arg0: i32, %arg1: i32) -> (i32, i32) {
    %c0_i32 = arith.constant 0 : i32
    %c0_i32_0 = arith.constant 0 : i32
    return %c0_i32, %arg0 : i32, i32
  }
}

</mosaic_0001>

<bundles_post_ra>
// kernel: tpu_custom_call.1
= control target key start
LH: loop header
LB: loop body
LE: loop exit
PB: predicated region body
PF: predicated region fallthrough
CT: control target
= control target key end

     0   :  { %7 = vsyncpa [#allocation4], 0  ;;  %s362_s0 = inlined_call_operand.hbm [shape: f32[256,128], index: 0, kind: input, shape index: {}]   ;;  %s363_s1 = inlined_call_operand.vmem [shape: f32[1,128], index: 1, kind: input, shape index: {}]   ;;  %s364_s2 = inlined_call_operand.hbm [shape: f32[1,256], index: 2, kind: output, shape index: {}]  }
   0x1   :  { %8 = vsyncpa [#allocation5], 0  ;;  %s304_s9 = smov [#allocation3]   ;;  %s256_s13 = scalar_lea.hbm %s362_s0, 4096 }
   0x2   :  { %s14_s10 = sshll.u32 %s304_s9, 4  ;;  %p257_p0 = scmp.ne.s32.totalorder %s362_s0, %s256_s13  ;;  %s15_s10 = int_to_ptr.vmem [resolvable:$true] %s14_s10 }
   0x3   :  { %p260_p1 = scmp.lt.u32.totalorder %s256_s13, %s362_s0 }
   0x5   :  { %p262_p2 = pnand %p260_p1, %p257_p0 }
   0x7   :  { %265 = shalt.err (!%p262_p2)
}
   0x8   :  { %s266_s18 = scalar_lea.vmem %s15_s10, 4096  ;;  %p271_p4 = scmp.lt.s32.totalorder %s15_s10, %s15_s10 }
   0x9   :  { %p267_p3 = scmp.ne.s32.totalorder %s15_s10, %s266_s18  ;;  %p272_p5 = scmp.lt.s32.totalorder %s266_s18, %s266_s18 }
   0xb   :  { %p273_p6 = por %p272_p5, %p271_p4 }
   0xd   :  { %p274_p7 = pnand %p273_p6, %p267_p3 }
   0xf   :  { %277 = shalt.err (!%p274_p7)
}
  0x10   :  { %s305_s19 = smov 128   ;;  %s306_s20 = smov 8  }
  0x11   :  { %20 = dma.hbm_to_vmem [thread:$0]  %s362_s0, 4096, %s15_s10, [#allocation4], %s305_s19, %s305_s19, %s306_s20  }
  0x12   :  { %300 = dma.done.wait [#allocation4], 4096  }
  0x13   :  { %301 = vsyncadd [#allocation4], 4294963200  ;;  %v53_v0 = vld [vmem:[#allocation3 + $0x80] sm:$0xff]  ;;  %v54_v1 = vld [vmem:[#allocation3 + $0x88] sm:$0xff]  ;;  %v30_v49 = vlaneseq  ;;  %v307_v51 = vmov 0.0  }
  0x14   :  { %v37_v2 = vld [vmem:[#allocation3] sm:$0xff]  ;;  %v218_v3 = vpack.c.bf16 %v54_v1, %v53_v0  ;;  %v38_v4 = vld [vmem:[#allocation3 + $0x8] sm:$0xff]  ;;  %v55_v5 = vld [vmem:[#allocation3 + $0x90] sm:$0xff]  ;;  %v308_v52 = vmov 1966171168  }
  0x15   :  { %v56_v6 = vld [vmem:[#allocation3 + $0x98] sm:$0xff]  ;;  %v220_v7 = vpack.c.bf16 %v38_v4, %v37_v2  ;;  %v39_v9 = vld [vmem:[#allocation3 + $0x10] sm:$0xff]  ;;  %v57_v11 = vld [vmem:[#allocation3 + $0xa0] sm:$0xff]  ;;  %vm340_vm0 = vcmp.lt.s32.totalorder %v30_v49, 256  ;;  %v144_v53 = vunpack.c.l.s4 %v308_v52  ;;  %v147_v55 = vshrl.u32 %v30_v49, 7 }
  0x16   :  { %v222_v8 = vpack.c.bf16 %v56_v6, %v55_v5  ;;  %219 = vmatprep.subr.bf16.mxu0 %v218_v3  ;;  %v40_v10 = vld [vmem:[#allocation3 + $0x18] sm:$0xff]  ;;  %v58_v12 = vld [vmem:[#allocation3 + $0xa8] sm:$0xff]  ;;  %v41_v16 = vld [vmem:[#allocation3 + $0x20] sm:$0xff]  ;;  %34 = vst.msk [vmem:[#allocation2] sm:$0x3] %vm340_vm0, %v307_v51 }
  0x17   :  { %221 = vmatpush3.bf16.xpose.msra.mxu0 %v220_v7  ;;  %v224_v13 = vpack.c.bf16 %v40_v10, %v39_v9  ;;  %v226_v14 = vpack.c.bf16 %v58_v12, %v57_v11  ;;  %v36_v15 = vld [vmem:[%s363_s1] sm:$0x1]  ;;  %v42_v17 = vld [vmem:[#allocation3 + $0x28] sm:$0xff]  ;;  %v59_v18 = vld [vmem:[#allocation3 + $0xb0] sm:$0xff]  ;;  %v145_v54 = vunpack.c.0.s8 %v144_v53  ;;  %s309_s1 = smov [#allocation6]  }
  0x18   :  { %223 = vmatprep.subr.bf16.mxu0 %v222_v8  ;;  %216 = vmatprep.mubr.f32.mxu0 %v36_v15  ;;  %v60_v19 = vld [vmem:[#allocation3 + $0xb8] sm:$0xff]  ;;  %v228_v20 = vpack.c.bf16 %v42_v17, %v41_v16  ;;  %v43_v22 = vld [vmem:[#allocation3 + $0x30] sm:$0xff]  ;;  %v61_v24 = vld [vmem:[#allocation3 + $0xc0] sm:$0xff]  ;;  %s175_s24 = sshll.u32 %s309_s1, 4  ;;  %s176_s24 = int_to_ptr.vmem [resolvable:$true] %s175_s24 }
  0x19   :  { %v230_v21 = vpack.c.bf16 %v60_v19, %v59_v18  ;;  %v44_v23 = vld [vmem:[#allocation3 + $0x38] sm:$0xff]  ;;  %v62_v25 = vld [vmem:[#allocation3 + $0xc8] sm:$0xff]  ;;  %v45_v28 = vld [vmem:[#allocation3 + $0x40] sm:$0xff]  ;;  %v148_v57 = vsub.s32 %v145_v54, %v147_v55  ;;  %s278_s25 = scalar_lea.vmem %s176_s24, 32  ;;  %p283_p9 = scmp.lt.s32.totalorder %s176_s24, %s176_s24 }
  0x1a   :  { %v232_v26 = vpack.c.bf16 %v44_v23, %v43_v22  ;;  %v234_v27 = vpack.c.bf16 %v62_v25, %v61_v24  ;;  %v46_v29 = vld [vmem:[#allocation3 + $0x48] sm:$0xff]  ;;  %v63_v30 = vld [vmem:[#allocation3 + $0xd0] sm:$0xff]  ;;  %v64_v31 = vld [vmem:[#allocation3 + $0xd8] sm:$0xff]  ;;  %p279_p8 = scmp.ne.s32.totalorder %s176_s24, %s278_s25  ;;  %p284_p10 = scmp.lt.s32.totalorder %s278_s25, %s278_s25 }
  0x1b   :  { %v236_v32 = vpack.c.bf16 %v46_v29, %v45_v28  ;;  %v238_v33 = vpack.c.bf16 %v64_v31, %v63_v30  ;;  %v47_v34 = vld [vmem:[#allocation3 + $0x50] sm:$0xff]  ;;  %v48_v35 = vld [vmem:[#allocation3 + $0x58] sm:$0xff]  ;;  %v65_v36 = vld [vmem:[#allocation3 + $0xe0] sm:$0xff] }
  0x1c   :  { %v66_v37 = vld [vmem:[#allocation3 + $0xe8] sm:$0xff]  ;;  %v240_v38 = vpack.c.bf16 %v48_v35, %v47_v34  ;;  %v49_v40 = vld [vmem:[#allocation3 + $0x60] sm:$0xff]  ;;  %v67_v42 = vld [vmem:[#allocation3 + $0xf0] sm:$0xff]  ;;  %p285_p11 = por %p284_p10, %p283_p9 }
  0x1d   :  { %v242_v39 = vpack.c.bf16 %v66_v37, %v65_v36  ;;  %v50_v41 = vld [vmem:[#allocation3 + $0x68] sm:$0xff]  ;;  %v68_v43 = vld [vmem:[#allocation3 + $0xf8] sm:$0xff]  ;;  %v51_v46 = vld [vmem:[#allocation3 + $0x70] sm:$0xff] }
  0x1e   :  { %v244_v44 = vpack.c.bf16 %v50_v41, %v49_v40  ;;  %v246_v45 = vpack.c.bf16 %v68_v43, %v67_v42  ;;  %v52_v47 = vld [vmem:[#allocation3 + $0x78] sm:$0xff]  ;;  %p286_p12 = pnand %p285_p11, %p279_p8 }
  0x1f   :  { %225 = vmatpush3.bf16.xpose.msra.mxu0 %v224_v13  ;;  %v248_v48 = vpack.c.bf16 %v52_v47, %v51_v46  ;;  %v35_v61 = vld [vmem:[#allocation2] sm:$0x3] }
  0x20   :  { %227 = vmatprep.subr.bf16.mxu0 %v226_v14 }
  0x27   :  { %229 = vmatpush3.bf16.xpose.msra.mxu0 %v228_v20 }
  0x28   :  { %231 = vmatprep.subr.bf16.mxu0 %v230_v21 }
  0x2f   :  { %233 = vmatpush3.bf16.xpose.msra.mxu0 %v232_v26 }
  0x30   :  { %235 = vmatprep.subr.bf16.mxu0 %v234_v27 }
  0x37   :  { %237 = vmatpush3.bf16.xpose.msra.mxu0 %v236_v32 }
  0x38   :  { %239 = vmatprep.subr.bf16.mxu0 %v238_v33 }
  0x3f   :  { %241 = vmatpush3.bf16.xpose.msra.mxu0 %v240_v38 }
  0x40   :  { %243 = vmatprep.subr.bf16.mxu0 %v242_v39 }
  0x47   :  { %245 = vmatpush3.bf16.xpose.msra.mxu0 %v244_v44 }
  0x48   :  { %247 = vmatprep.subr.bf16.mxu0 %v246_v45 }
  0x4f   :  { %249 = vmatpush3.bf16.xpose.msra.mxu0 %v248_v48 }
  0x56   :  { %217 = vmatmul.mubr.f32.vlgmr.msra.gmra.mrb[0].mxu0 %v36_v15 }
 0x129   :  { %v135_v56 = vpop.f32.mrb[0].mxu0 }
 0x12a   :  { %v137_v58 = vpop.f32.mrb[1].mxu0 }
 0x12b   :  { %v142_v59 = vcombine.low %v135_v56, %v137_v58 }
 0x12d   :  { %v149_v60 = vrot.slane %v142_v59, %v148_v57 }
 0x12f   :  { %v156_v62 = vrot.slane %v149_v60, %v148_v57 }
 0x131   :  { %v158_v63 = vadd.f32 %v156_v62, %v35_v61 }
 0x133   :  { %163 = vst.msk [vmem:[#allocation2] sm:$0x3] %vm340_vm0, %v158_v63 }
 0x13a   :  { %v167_v0 = vld [vmem:[#allocation2] sm:$0x3] }
 0x13b   :  { %168 = vst.msk [vmem:[#allocation6] sm:$0x3] %vm340_vm0, %v167_v0 }
 0x13c   :  { %289 = shalt.err (!%p286_p12)
}
 0x13d   :  { %s290_s28 = scalar_lea.hbm %s364_s2, 32 }
 0x13e   :  { %p291_p13 = scmp.ne.s32.totalorder %s364_s2, %s290_s28  ;;  %p294_p0 = scmp.lt.u32.totalorder %s290_s28, %s364_s2 }
 0x140   :  { %p296_p1 = pnand %p294_p0, %p291_p13 }
 0x142   :  { %299 = shalt.err (!%p296_p1)
}
 0x143   :  { %178 = dma.vmem_to_hbm [thread:$0]  %s176_s24, 32, %s364_s2, [#allocation5]  }
 0x144   :  { %302 = dma.done.wait [#allocation5], 32  }
 0x145   :  { %303 = vsyncadd [#allocation5], 4294967264 }
 0x146   :  { %182 = vsyncpa [#allocation4], 1 }
 0x147   :  { %183 = vsyncpa [#allocation5], 1 }

</bundles_post_ra>
